<compile_context>
chip_gen: v7x
topology: tpu7x:2x2x1
jax: 0.10.0
libtpu: 0.0.40
codegen_flags: <defaults>
</compile_context>

<pallas_src>
import functools

import jax
import jax.numpy as jnp
import numpy as np
from jax.experimental import pallas as pl
from jax.experimental.pallas import tpu as pltpu

_MIB = 1024 * 1024


def _round_up(x, m):
    return (x + m - 1) // m * m


def _mixer_kernel(w_ref, feat_ref, out_ref, *, num_feats):
    # w_ref   : SMEM (num_feats,) f32  -- gamma * softmax(scalars), prefetched
    # feat_ref: VMEM (num_feats, tS, D)
    # out_ref : VMEM (tS, D)
    acc = w_ref[0] * feat_ref[0].astype(jnp.float32)
    for l in range(1, num_feats):          # static unroll (num_feats is small)
        acc += w_ref[l] * feat_ref[l].astype(jnp.float32)
    out_ref[...] = acc.astype(out_ref.dtype)


def elmo_mix(features, scalars, gamma, *, out_dtype=jnp.float32,
             max_tile_rows=2048):
    """features: (L+1, S, D); scalars: (L+1,) f32; gamma: scalar f32.

    Returns gamma * sum_l softmax(scalars)_l * features[l]  -> (S, D) out_dtype.
    Features may be f32 or bf16; accumulation is always f32.
    """
    L1, S, D = features.shape

    # Per-layer weights (gamma folded in) computed once outside the hot path;
    # they ride to SMEM via scalar prefetch.
    weights = (jnp.asarray(gamma, jnp.float32)
               * jax.nn.softmax(scalars.astype(jnp.float32))).reshape(L1)

    # Lane-dense output: pad the feature dim to a multiple of 128 so stores
    # are unmasked full-lane vst; the padded columns are sliced off afterwards.
    D_pad = _round_up(D, 128)
    if D_pad != D:
        features = jnp.pad(features, ((0, 0), (0, 0), (0, D_pad - D)))

    feat_bytes = jnp.dtype(features.dtype).itemsize
    out_bytes = jnp.dtype(out_dtype).itemsize

    # Generation-aware VMEM budget: ~60% of physical, capped at 48 MiB
    # (-> ~40 MiB on v7x's 64 MiB/TC, 48 MiB on v5e/v6e's 128 MiB).
    try:
        vmem_cap = int(pltpu.get_tpu_info().vmem_capacity_bytes)
    except Exception:  # conservative fallback if the query is unavailable
        vmem_cap = 64 * _MIB
    budget = min(int(vmem_cap * 0.6), 48 * _MIB)

    # Sublane packing of the input dtype (8 for f32, 16 for bf16, 32 for int8).
    sublane = max(8, 32 // feat_bytes)

    # Double-buffered (L1, tS, D_pad) input + double-buffered (tS, D_pad) output.
    per_row_bytes = 2 * L1 * D_pad * feat_bytes + 2 * D_pad * out_bytes
    tS = max(sublane, (budget // per_row_bytes) // sublane * sublane)
    tS = min(tS, max_tile_rows)

    # Short-sequence case: keep >= 4 grid steps when S allows so the
    # "parallel" axis can shard across v7x's two TensorCores; also balances
    # tile sizes so there is no tiny remainder block.
    min_tiles = min(4, pl.cdiv(S, sublane))
    n_tiles = max(pl.cdiv(S, tS), min_tiles)
    tS = _round_up(pl.cdiv(S, n_tiles), sublane)
    grid = (pl.cdiv(S, tS),)

    # Explicit scoped-VMEM limit: actual double-buffered usage + headroom,
    # never above physical (guards the tS floor for very large D).
    usage = 2 * L1 * tS * D_pad * feat_bytes + 2 * tS * D_pad * out_bytes
    vmem_limit = int(min(vmem_cap, usage + 8 * _MIB))

    cost = pl.CostEstimate(
        flops=2 * L1 * S * D_pad,
        transcendentals=0,
        bytes_accessed=L1 * S * D_pad * feat_bytes + S * D_pad * out_bytes)

    kernel = functools.partial(_mixer_kernel, num_feats=L1)

    out = pl.pallas_call(
        kernel,
        out_shape=jax.ShapeDtypeStruct((S, D_pad), out_dtype),
        grid_spec=pltpu.PrefetchScalarGridSpec(
            num_scalar_prefetch=1,          # weights -> SMEM, passed first
            grid=grid,
            in_specs=[
                # all L1 layers of one sequence tile per step
                pl.BlockSpec((L1, tS, D_pad), lambda i, w: (0, i, 0)),
            ],
            out_specs=pl.BlockSpec((tS, D_pad), lambda i, w: (i, 0)),
        ),
        compiler_params=pltpu.CompilerParams(
            dimension_semantics=("parallel",),   # shards tiles across v7x TCs
            vmem_limit_bytes=vmem_limit),
        cost_estimate=cost,
    )(weights, features)

    return out[:, :D] if D_pad != D else out


if __name__ == "__main__":
    key = jax.random.PRNGKey(0)
    num_layer = 2          # ELMoMixer(num_layer=2) -> 3 mixed representations
    vocab, emb, seq = 50, 64, 8
    D = 2 * emb            # ELMo layer features are 2*emb (fwd||bwd concat)
    k_emb, k_feat, k_tok = jax.random.split(key, 3)

    # ---- plain-JAX stand-in for the external `self.elmo` module (glue) ----
    emb_table = jax.random.normal(k_emb, (vocab, emb), jnp.float32) * 0.02
    layer_ws = (jax.random.normal(k_feat, (num_layer, D, D), jnp.float32)
                / jnp.sqrt(jnp.float32(D)))

    x = jax.random.randint(k_tok, (seq,), 0, vocab)          # token ids (seq,)
    x_batch = x[None, :]                                      # unsqueeze(0)
    embed = emb_table[x_batch]                                # elmo._embed -> (1, S, emb)
    feat0 = jnp.concatenate([embed, embed], axis=2)           # cat([embed, embed], dim=2)
    feats = [feat0]
    h = feat0
    for i in range(num_layer):                                # elmo(x_batch) features
        h = jnp.tanh(h @ layer_ws[i])
        feats.append(h)
    features = jnp.concatenate(feats, axis=0)                 # (L+1, S, D), batch==1 folded

    # ---- ELMoMixer parameters, deterministic init as in __init__ ----
    scalars = jnp.full((num_layer + 1,), 1.0 / (num_layer + 1), jnp.float32)
    gamma = jnp.float32(1.0)

    # TODO(synk): the reference's default normal_fn = nn.init.xavier_uniform_
    # re-randomizes each feature tensor in place with torch RNG (discarding the
    # actual ELMo outputs); there is no deterministic Pallas equivalent, so it
    # is treated as the identity and the real features are mixed.

    out = elmo_mix(features, scalars, gamma)
    out = jax.block_until_ready(out)
    assert out.shape == (seq, D)

    # pure-JAX reference check
    w = jax.nn.softmax(scalars)
    ref = gamma * jnp.sum(features * w[:, None, None], axis=0)
    np.testing.assert_allclose(np.asarray(out), np.asarray(ref),
                               rtol=1e-5, atol=1e-5)
    print("KERNEL_OK")
</pallas_src>

<mosaic_0001>
module attributes {stable_mosaic.version = 11 : i64} {
  func.func @_mixer_kernel(%arg0: i32, %arg1: memref<3xf32, #tpu.memory_space<smem>>, %arg2: memref<3x8x128xf32, #tpu.memory_space<vmem>>, %arg3: memref<8x128xf32, #tpu.memory_space<vmem>>) attributes {dimension_semantics = [#tpu.dimension_semantics<parallel>], iteration_bounds = array<i64: 1>, scalar_prefetch = 1 : i64, scratch_operands = 0 : i64, tpu.core_type = #tpu.core_type<tc>, window_params = [{transform_indices = @transform_0, window_bounds = array<i64: 3, 8, 128>}, {transform_indices = @transform_1, window_bounds = array<i64: 8, 128>}]} {
    %c0 = arith.constant 0 : index
    %0 = memref.load %arg1[%c0] : memref<3xf32, #tpu.memory_space<smem>>
    %c0_0 = arith.constant 0 : index
    %c0_1 = arith.constant 0 : index
    %c0_2 = arith.constant 0 : index
    %1 = vector.load %arg2[%c0_0, %c0_1, %c0_2] : memref<3x8x128xf32, #tpu.memory_space<vmem>>, vector<1x8x128xf32>
    %2 = vector.shape_cast %1 : vector<1x8x128xf32> to vector<8x128xf32>
    %3 = vector.broadcast %0 : f32 to vector<8x128xf32>
    %4 = arith.mulf %3, %2 : vector<8x128xf32>
    %c1 = arith.constant 1 : index
    %5 = memref.load %arg1[%c1] : memref<3xf32, #tpu.memory_space<smem>>
    %c1_3 = arith.constant 1 : index
    %c0_4 = arith.constant 0 : index
    %c0_5 = arith.constant 0 : index
    %6 = vector.load %arg2[%c1_3, %c0_4, %c0_5] : memref<3x8x128xf32, #tpu.memory_space<vmem>>, vector<1x8x128xf32>
    %7 = vector.shape_cast %6 : vector<1x8x128xf32> to vector<8x128xf32>
    %8 = vector.broadcast %5 : f32 to vector<8x128xf32>
    %9 = arith.mulf %8, %7 : vector<8x128xf32>
    %10 = arith.addf %4, %9 : vector<8x128xf32>
    %c2 = arith.constant 2 : index
    %11 = memref.load %arg1[%c2] : memref<3xf32, #tpu.memory_space<smem>>
    %c2_6 = arith.constant 2 : index
    %c0_7 = arith.constant 0 : index
    %c0_8 = arith.constant 0 : index
    %12 = vector.load %arg2[%c2_6, %c0_7, %c0_8] : memref<3x8x128xf32, #tpu.memory_space<vmem>>, vector<1x8x128xf32>
    %13 = vector.shape_cast %12 : vector<1x8x128xf32> to vector<8x128xf32>
    %14 = vector.broadcast %11 : f32 to vector<8x128xf32>
    %15 = arith.mulf %14, %13 : vector<8x128xf32>
    %16 = arith.addf %10, %15 : vector<8x128xf32>
    %c0_9 = arith.constant 0 : index
    %c0_10 = arith.constant 0 : index
    %17 = vector.load %arg3[%c0_9, %c0_10] : memref<8x128xf32, #tpu.memory_space<vmem>>, vector<8x128xf32>
    tpu.vector_store %arg3[%c0_9, %c0_10], %16 {strides = array<i32>} : memref<8x128xf32, #tpu.memory_space<vmem>>, vector<8x128xf32>,
    return
  }
  func.func @transform_0(%arg0: i32, %arg1: memref<3xf32, #tpu.memory_space<smem>>) -> (i32, i32, i32) {
    %c0_i32 = arith.constant 0 : i32
    %c0_i32_0 = arith.constant 0 : i32
    %c0_i32_1 = arith.constant 0 : i32
    return %c0_i32, %arg0, %c0_i32_0 : i32, i32, i32
  }
  func.func @transform_1(%arg0: i32, %arg1: memref<3xf32, #tpu.memory_space<smem>>) -> (i32, i32) {
    %c0_i32 = arith.constant 0 : i32
    %c0_i32_0 = arith.constant 0 : i32
    return %arg0, %c0_i32 : i32, i32
  }
}

</mosaic_0001>

<bundles_post_ra>
// kernel: tpu_custom_call.1
= control target key start
LH: loop header
LB: loop body
LE: loop exit
PB: predicated region body
PF: predicated region fallthrough
CT: control target
= control target key end

     0   :  { %s183_s0 = inlined_call_operand.hbm [shape: f32[3], index: 0, kind: input, shape index: {}]   ;;  %s184_s1 = inlined_call_operand.hbm [shape: f32[3,8,128], index: 1, kind: input, shape index: {}]   ;;  %s185_s2 = inlined_call_operand.hbm [shape: f32[8,128], index: 2, kind: output, shape index: {}]  }
   0x1   :  { %s67_s11 = scalar_lea.hbm %s183_s0, 16 }
   0x2   :  { %p68_p0 = scmp.ne.s32.totalorder %s183_s0, %s67_s11  ;;  %p71_p1 = scmp.lt.u32.totalorder %s67_s11, %s183_s0 }
   0x4   :  { %p73_p2 = pnand %p71_p1, %p68_p0 }
   0x6   :  { %76 = shalt.err (!%p73_p2)  }
   0x7   :  { %s127_s16 = smov [#allocation3]  }
   0x8   :  { %8 = dma.hbm_to_smem %s183_s0, 16, %s127_s16, [#allocation2] }
   0x9   :  { %121 = dma.done.wait [#allocation2], 16 }
   0xa   :  { %122 = vsyncadd [#allocation2], 4294967280 }
   0xb   :  { %10 = sfence }
   0xc   :  { %11 = vsyncpa [#allocation5], 0 }
   0xd   :  { %12 = vsyncpa [#allocation6], 0  ;;  %s128_s19 = smov [#allocation4]   ;;  %s77_s23 = scalar_lea.hbm %s184_s1, 384 }
   0xe   :  { %s18_s20 = sshll.u32 %s128_s19, 4  ;;  %p78_p3 = scmp.ne.s32.totalorder %s184_s1, %s77_s23  ;;  %s19_s20 = int_to_ptr.vmem [resolvable:$true] %s18_s20 }
   0xf   :  { %p81_p4 = scmp.lt.u32.totalorder %s77_s23, %s184_s1 }
  0x11   :  { %p83_p5 = pnand %p81_p4, %p78_p3 }
  0x13   :  { %86 = shalt.err (!%p83_p5)
}
  0x14   :  { %s87_s0 = scalar_lea.vmem %s19_s20, 384  ;;  %p92_p7 = scmp.lt.s32.totalorder %s19_s20, %s19_s20 }
  0x15   :  { %p88_p6 = scmp.ne.s32.totalorder %s19_s20, %s87_s0  ;;  %p93_p8 = scmp.lt.s32.totalorder %s87_s0, %s87_s0 }
  0x17   :  { %p94_p9 = por %p93_p8, %p92_p7 }
  0x19   :  { %p95_p10 = pnand %p94_p9, %p88_p6 }
  0x1b   :  { %98 = shalt.err (!%p95_p10)
}
  0x1c   :  { %s129_s28 = smov 128   ;;  %s130_s29 = smov 8  }
  0x1d   :  { %24 = dma.hbm_to_vmem [thread:$0]  %s184_s1, 384, %s19_s20, [#allocation5], %s129_s28, %s129_s28, %s130_s29  }
  0x1e   :  { %123 = dma.done.wait [#allocation5], 384  }
  0x1f   :  { %124 = vsyncadd [#allocation5], 4294966912  ;;  %s28_s4 = sld [smem:[#allocation3]]  ;;  %s60_s5 = sld [smem:[#allocation3 + $0x1]]  ;;  %v29_v0 = vld [vmem:[#allocation4] sm:$0xff]  ;;  %v34_v2 = vld [vmem:[#allocation4 + $0x8] sm:$0xff] }
  0x20   :  { %s61_s6 = sld [smem:[#allocation3 + $0x2]]  ;;  %v40_v4 = vld [vmem:[#allocation4 + $0x10] sm:$0xff]  ;;  %s131_s7 = smov [#allocation7]  }
  0x21   :  { %s51_s8 = sshll.u32 %s131_s7, 4  ;;  %s52_s8 = int_to_ptr.vmem [resolvable:$true] %s51_s8 }
  0x22   :  { %s99_s1 = scalar_lea.vmem %s52_s8, 128  ;;  %p104_p12 = scmp.lt.s32.totalorder %s52_s8, %s52_s8 }
  0x23   :  { %p100_p11 = scmp.ne.s32.totalorder %s52_s8, %s99_s1  ;;  %p105_p13 = scmp.lt.s32.totalorder %s99_s1, %s99_s1 }
  0x25   :  { %v30_v1 = vstv %s28_s4  ;;  %v35_v3 = vstv %s60_s5  ;;  %p106_p0 = por %p105_p13, %p104_p12 }
  0x26   :  { %v31_v5 = vmul.f32 %v30_v1, %v29_v0  ;;  %v36_v6 = vmul.f32 %v35_v3, %v34_v2  ;;  %v41_v7 = vstv %s61_s6 }
  0x27   :  { %v42_v8 = vmul.f32 %v41_v7, %v40_v4  ;;  %p107_p1 = pnand %p106_p0, %p100_p11 }
  0x28   :  { %v37_v9 = vadd.f32 %v36_v6, %v31_v5 }
  0x2a   :  { %v43_v10 = vadd.f32 %v42_v8, %v37_v9 }
  0x2c   :  { %44 = vst [vmem:[#allocation7] sm:$0xff] %v43_v10 }
  0x2d   :  { %110 = shalt.err (!%p107_p1)
}
  0x2e   :  { %s111_s11 = scalar_lea.hbm %s185_s2, 128 }
  0x2f   :  { %p112_p2 = scmp.ne.s32.totalorder %s185_s2, %s111_s11  ;;  %p115_p3 = scmp.lt.u32.totalorder %s111_s11, %s185_s2 }
  0x31   :  { %p117_p4 = pnand %p115_p3, %p112_p2 }
  0x33   :  { %120 = shalt.err (!%p117_p4)
}
  0x34   :  { %54 = dma.vmem_to_hbm [thread:$0]  %s52_s8, 128, %s185_s2, [#allocation6]  }
  0x35   :  { %125 = dma.done.wait [#allocation6], 128  }
  0x36   :  { %126 = vsyncadd [#allocation6], 4294967168 }
  0x37   :  { %58 = vsyncpa [#allocation5], 1 }
  0x38   :  { %59 = vsyncpa [#allocation6], 1 }

</bundles_post_ra>
